<compile_context>
chip_gen: v7x
topology: tpu7x:2x2x1
jax: 0.10.0
libtpu: 0.0.40
codegen_flags: <defaults>
</compile_context>

<pallas_src>
import functools

import jax
import jax.numpy as jnp
from jax.experimental import pallas as pl
from jax.experimental.pallas import tpu as pltpu


def _vmem_capacity_bytes():
    """Best-effort VMEM capacity query; conservative fallback (v7x per-TC)."""
    try:
        cap = getattr(pltpu.get_tpu_info(), "vmem_capacity_bytes", None)
        if cap:
            return int(cap)
    except Exception:
        pass
    return 64 << 20


def _plan_tiling(n, c, itemsizes, tile_b_override=None):
    """Pick (tile_b, vmem_limit) from the chip's VMEM capacity."""
    cap = _vmem_capacity_bytes()
    if cap >= (100 << 20):            # 128 MiB-VMEM parts (v5e / v6e)
        target_block = 8 << 20        # per input, per pipeline buffer
        limit_cap = 100 << 20
    else:                             # 64 MiB per-TC parts (v7x)
        target_block = 4 << 20
        limit_cap = 56 << 20

    # Sublane packing granularity: 8 rows for 32-bit, 16 for 16-bit inputs.
    gran = 8 if min(itemsizes) >= 4 else 16

    if tile_b_override is not None:
        assert tile_b_override % gran == 0, (tile_b_override, gran)
        tile_b = tile_b_override
    else:
        per_row_bytes = max(c * max(itemsizes), 1)
        rows = max(target_block // per_row_bytes, 1)
        rows = max((rows // gran) * gran, gran)
        n_up = ((n + gran - 1) // gran) * gran
        tile_b = min(rows, n_up)

    # Double-buffered in-flight footprint: 2 bufs x (x block + t block) + out.
    footprint = 2 * tile_b * c * (itemsizes[0] + itemsizes[1]) + 2 * 8 * 128 * 4
    vmem_limit = int(min(max(footprint + (8 << 20), 32 << 20), limit_cap))
    return tile_b, vmem_limit


def _nll_smooth_kernel(x_ref, t_ref, out_ref, *, confidence, smoothing,
                       num_classes, num_rows):
    # x.float() / target.float() semantics from the PyTorch module.
    x = x_ref[...].astype(jnp.float32)
    t = t_ref[...].astype(jnp.float32)
    tile_b = x_ref.shape[0]

    # Numerically stable log_softmax along the last (class/lane) axis.
    m = jnp.max(x, axis=-1, keepdims=True)
    shifted = x - m
    lse = jnp.log(jnp.sum(jnp.exp(shifted), axis=-1, keepdims=True))
    logprobs = shifted - lse                                     # (tile_b, C)

    # Fused weighting:
    #   confidence * sum(-logprobs * t) + smoothing * mean(-logprobs)
    # == sum(-logprobs * (confidence * t + smoothing / C))
    w = confidence * t + (smoothing / num_classes)
    per_row = -jnp.sum(logprobs * w, axis=-1, keepdims=True)     # (tile_b, 1)

    # Mask rows of the ragged last tile with a select (NOT a multiply) so
    # NaN/Inf coming from garbage out-of-bounds rows cannot leak.
    row = (pl.program_id(0) * tile_b
           + jax.lax.broadcasted_iota(jnp.int32, per_row.shape, 0))
    per_row = jnp.where(row < num_rows, per_row, 0.0)

    # One scalar per grid step, written as a single dense (8,128) vreg store
    # (lane-dense out_spec -> no masked vst.msk storm).
    partial = jnp.sum(per_row)
    out_ref[...] = jnp.full(out_ref.shape, partial, dtype=out_ref.dtype)


def nll_multilabel_smooth(x, target, *, smoothing=0.1,
                          target_stream_dtype=None, tile_b=None):
    """Training-mode NLLMultiLabelSmooth forward. Returns a scalar f32.

    target_stream_dtype: optionally narrow the streamed target dtype (e.g.
      jnp.bfloat16) to cut HBM traffic; exact for 0/1 one-hot targets.
    tile_b: optional batch-tile override (must be a multiple of 8/16).
    """
    assert x.ndim == 2 and x.shape == target.shape
    n, c = x.shape
    confidence = 1.0 - smoothing

    if target_stream_dtype is not None:
        target = target.astype(target_stream_dtype)

    itemsizes = (jnp.dtype(x.dtype).itemsize, jnp.dtype(target.dtype).itemsize)
    tile_b, vmem_limit = _plan_tiling(n, c, itemsizes, tile_b)
    num_tiles = int(pl.cdiv(n, tile_b))

    kernel = functools.partial(
        _nll_smooth_kernel,
        confidence=confidence,
        smoothing=smoothing,
        num_classes=c,
        num_rows=n,
    )

    partials = pl.pallas_call(
        kernel,
        out_shape=jax.ShapeDtypeStruct((num_tiles, 8, 128), jnp.float32),
        grid=(num_tiles,),
        in_specs=[
            pl.BlockSpec((tile_b, c), lambda i: (i, 0)),
            pl.BlockSpec((tile_b, c), lambda i: (i, 0)),
        ],
        # Each grid step owns a distinct output block -> batch axis is truly
        # parallel (megacore sharding on v7x).
        out_specs=pl.BlockSpec((1, 8, 128), lambda i: (i, 0, 0)),
        compiler_params=pltpu.CompilerParams(
            dimension_semantics=("parallel",),
            vmem_limit_bytes=vmem_limit,
        ),
    )(x, target)

    return jnp.sum(partials[:, 0, 0]) / n


def _reference(x, target, smoothing=0.1):
    x = x.astype(jnp.float32)
    target = target.astype(jnp.float32)
    logprobs = jax.nn.log_softmax(x, axis=-1)
    nll_loss = jnp.sum(-logprobs * target, axis=-1)
    smooth_loss = -jnp.mean(logprobs, axis=-1)
    loss = (1.0 - smoothing) * nll_loss + smoothing * smooth_loss
    return jnp.mean(loss)


if __name__ == "__main__":
    key = jax.random.PRNGKey(0)
    kx, kt, kx2, kt2, kx3, kt3 = jax.random.split(key, 6)

    # Check 1: lane-aligned class dim, f32 inputs, single tile.
    N, C = 16, 128
    x = jax.random.normal(kx, (N, C), dtype=jnp.float32)
    target = jax.nn.one_hot(jax.random.randint(kt, (N,), 0, C), C,
                            dtype=jnp.float32)
    loss = nll_multilabel_smooth(x, target, smoothing=0.1)
    jax.block_until_ready(loss)
    ref = _reference(x, target, smoothing=0.1)
    assert jnp.allclose(loss, ref, rtol=1e-5, atol=1e-5), (loss, ref)

    # Check 2: ragged batch (in-kernel masking), non-128 class dim, bf16.
    N2, C2 = 13, 96
    x2 = jax.random.normal(kx2, (N2, C2), dtype=jnp.bfloat16)
    target2 = jax.nn.one_hot(jax.random.randint(kt2, (N2,), 0, C2), C2,
                             dtype=jnp.bfloat16)
    loss2 = nll_multilabel_smooth(x2, target2, smoothing=0.1)
    jax.block_until_ready(loss2)
    ref2 = _reference(x2, target2, smoothing=0.1)
    assert jnp.allclose(loss2, ref2, rtol=1e-5, atol=1e-5), (loss2, ref2)

    # Check 3: multi-tile grid with ragged last tile + narrowed (bf16) target
    # stream (exact for one-hot targets).
    N3, C3 = 40, 128
    x3 = jax.random.normal(kx3, (N3, C3), dtype=jnp.float32)
    target3 = jax.nn.one_hot(jax.random.randint(kt3, (N3,), 0, C3), C3,
                             dtype=jnp.float32)
    loss3 = nll_multilabel_smooth(x3, target3, smoothing=0.1,
                                  target_stream_dtype=jnp.bfloat16, tile_b=16)
    jax.block_until_ready(loss3)
    ref3 = _reference(x3, target3, smoothing=0.1)
    assert jnp.allclose(loss3, ref3, rtol=1e-5, atol=1e-5), (loss3, ref3)

    print("KERNEL_OK")
</pallas_src>

<mosaic_0001>
module attributes {stable_mosaic.version = 11 : i64} {
  func.func @_nll_smooth_kernel(%arg0: i32, %arg1: memref<16x128xf32, #tpu.memory_space<vmem>>, %arg2: memref<16x128xf32, #tpu.memory_space<vmem>>, %arg3: memref<1x8x128xf32, #tpu.memory_space<vmem>>) attributes {dimension_semantics = [#tpu.dimension_semantics<parallel>], iteration_bounds = array<i64: 1>, scalar_prefetch = 0 : i64, scratch_operands = 0 : i64, tpu.core_type = #tpu.core_type<tc>, window_params = [{transform_indices = @transform_0, window_bounds = array<i64: 16, 128>}, {transform_indices = @transform_1, window_bounds = array<i64: 16, 128>}, {transform_indices = @transform_2, window_bounds = array<i64: 1, 8, 128>}]} {
    %c0 = arith.constant 0 : index
    %c0_0 = arith.constant 0 : index
    %0 = vector.load %arg1[%c0, %c0_0] : memref<16x128xf32, #tpu.memory_space<vmem>>, vector<16x128xf32>
    %c0_1 = arith.constant 0 : index
    %c0_2 = arith.constant 0 : index
    %1 = vector.load %arg2[%c0_1, %c0_2] : memref<16x128xf32, #tpu.memory_space<vmem>>, vector<16x128xf32>
    %cst = arith.constant dense<0xFF800000> : vector<16xf32>
    %2 = vector.multi_reduction <maximumf>, %0, %cst [1] : vector<16x128xf32> to vector<16xf32>
    %3 = vector.shape_cast %2 : vector<16xf32> to vector<16x1xf32>
    %4 = vector.broadcast %3 : vector<16x1xf32> to vector<16x128xf32>
    %5 = arith.subf %0, %4 : vector<16x128xf32>
    %6 = math.exp %5 : vector<16x128xf32>
    %cst_3 = arith.constant dense<0.000000e+00> : vector<16xf32>
    %7 = vector.multi_reduction <add>, %6, %cst_3 [1] : vector<16x128xf32> to vector<16xf32>
    %8 = vector.shape_cast %7 : vector<16xf32> to vector<16x1xf32>
    %9 = math.log %8 : vector<16x1xf32>
    %10 = vector.broadcast %9 : vector<16x1xf32> to vector<16x128xf32>
    %11 = arith.subf %5, %10 : vector<16x128xf32>
    %cst_4 = arith.constant 0.899999976 : f32
    %12 = vector.broadcast %cst_4 : f32 to vector<16x128xf32>
    %13 = arith.mulf %12, %1 : vector<16x128xf32>
    %cst_5 = arith.constant 7.812500e-04 : f32
    %14 = vector.broadcast %cst_5 : f32 to vector<16x128xf32>
    %15 = arith.addf %13, %14 : vector<16x128xf32>
    %16 = arith.mulf %11, %15 : vector<16x128xf32>
    %cst_6 = arith.constant dense<0.000000e+00> : vector<16xf32>
    %17 = vector.multi_reduction <add>, %16, %cst_6 [1] : vector<16x128xf32> to vector<16xf32>
    %18 = vector.shape_cast %17 : vector<16xf32> to vector<16x1xf32>
    %cst_7 = arith.constant 0.000000e+00 : f32
    %19 = vector.broadcast %cst_7 : f32 to vector<16x1xf32>
    %20 = arith.subf %19, %18 : vector<16x1xf32>
    %c16_i32 = arith.constant 16 : i32
    %21 = arith.muli %arg0, %c16_i32 : i32
    %22 = tpu.iota {dimensions = array<i32: 0>} : vector<16x1xi32>
    %23 = vector.broadcast %21 : i32 to vector<16x1xi32>
    %24 = arith.addi %23, %22 : vector<16x1xi32>
    %c16_i32_8 = arith.constant 16 : i32
    %25 = vector.broadcast %c16_i32_8 : i32 to vector<16x1xi32>
    %26 = arith.cmpi slt, %24, %25 : vector<16x1xi32>
    %cst_9 = arith.constant 0.000000e+00 : f32
    %27 = vector.broadcast %cst_9 : f32 to vector<16x1xf32>
    %28 = arith.select %26, %20, %27 : vector<16x1xi1>, vector<16x1xf32>
    %29 = vector.shape_cast %28 : vector<16x1xf32> to vector<1x16x1xf32>
    %cst_10 = arith.constant dense<0.000000e+00> : vector<1xf32>
    %30 = vector.multi_reduction <add>, %29, %cst_10 [1, 2] : vector<1x16x1xf32> to vector<1xf32>
    %31 = vector.shape_cast %30 : vector<1xf32> to vector<1x1x1xf32>
    %32 = vector.extract %31[0, 0, 0] : f32 from vector<1x1x1xf32>
    %33 = vector.broadcast %32 : f32 to vector<1x8x128xf32>
    %c0_11 = arith.constant 0 : index
    %c0_12 = arith.constant 0 : index
    %c0_13 = arith.constant 0 : index
    %34 = vector.load %arg3[%c0_11, %c0_12, %c0_13] : memref<1x8x128xf32, #tpu.memory_space<vmem>>, vector<1x8x128xf32>
    tpu.vector_store %arg3[%c0_11, %c0_12, %c0_13], %33 {strides = array<i32>} : memref<1x8x128xf32, #tpu.memory_space<vmem>>, vector<1x8x128xf32>,
    return
  }
  func.func @transform_0(%arg0: i32) -> (i32, i32) {
    %c0_i32 = arith.constant 0 : i32
    %c0_i32_0 = arith.constant 0 : i32
    return %arg0, %c0_i32 : i32, i32
  }
  func.func @transform_1(%arg0: i32) -> (i32, i32) {
    %c0_i32 = arith.constant 0 : i32
    %c0_i32_0 = arith.constant 0 : i32
    return %arg0, %c0_i32 : i32, i32
  }
  func.func @transform_2(%arg0: i32) -> (i32, i32, i32) {
    %c0_i32 = arith.constant 0 : i32
    %c0_i32_0 = arith.constant 0 : i32
    %c0_i32_1 = arith.constant 0 : i32
    return %arg0, %c0_i32, %c0_i32_0 : i32, i32, i32
  }
}

</mosaic_0001>

<bundles_post_ra>
// kernel: tpu_custom_call.1
= control target key start
LH: loop header
LB: loop body
LE: loop exit
PB: predicated region body
PF: predicated region fallthrough
CT: control target
= control target key end

     0   :  { %7 = vsyncpa [#allocation3], 0  ;;  %s261_s0 = inlined_call_operand.hbm [shape: f32[16,128], index: 0, kind: input, shape index: {}]   ;;  %s262_s1 = inlined_call_operand.hbm [shape: f32[16,128], index: 1, kind: input, shape index: {}]   ;;  %s263_s2 = inlined_call_operand.hbm [shape: f32[1,8,128], index: 2, kind: output, shape index: {}]  }
   0x1   :  { %8 = vsyncpa [#allocation6], 0 }
   0x2   :  { %9 = vsyncpa [#allocation4], 0  ;;  %s205_s9 = smov [#allocation2]   ;;  %s133_s13 = scalar_lea.hbm %s261_s0, 256 }
   0x3   :  { %s15_s10 = sshll.u32 %s205_s9, 4  ;;  %p134_p0 = scmp.ne.s32.totalorder %s261_s0, %s133_s13  ;;  %s16_s10 = int_to_ptr.vmem [resolvable:$true] %s15_s10 }
   0x4   :  { %p137_p1 = scmp.lt.u32.totalorder %s133_s13, %s261_s0 }
   0x6   :  { %p139_p2 = pnand %p137_p1, %p134_p0 }
   0x8   :  { %142 = shalt.err (!%p139_p2)
}
   0x9   :  { %s143_s18 = scalar_lea.vmem %s16_s10, 256  ;;  %p148_p4 = scmp.lt.s32.totalorder %s16_s10, %s16_s10 }
   0xa   :  { %p144_p3 = scmp.ne.s32.totalorder %s16_s10, %s143_s18  ;;  %p149_p5 = scmp.lt.s32.totalorder %s143_s18, %s143_s18 }
   0xc   :  { %p150_p6 = por %p149_p5, %p148_p4 }
   0xe   :  { %p151_p7 = pnand %p150_p6, %p144_p3 }
  0x10   :  { %154 = shalt.err (!%p151_p7)
}
  0x11   :  { %s206_s19 = smov 128   ;;  %s207_s20 = smov 8  }
  0x12   :  { %21 = dma.hbm_to_vmem [thread:$0]  %s261_s0, 256, %s16_s10, [#allocation3], %s206_s19, %s206_s19, %s207_s20  }
  0x13   :  { %s208_s23 = smov [#allocation5]   ;;  %s155_s27 = scalar_lea.hbm %s262_s1, 256 }
  0x14   :  { %s27_s24 = sshll.u32 %s208_s23, 4  ;;  %p156_p8 = scmp.ne.s32.totalorder %s262_s1, %s155_s27  ;;  %s28_s24 = int_to_ptr.vmem [resolvable:$true] %s27_s24 }
  0x15   :  { %p159_p9 = scmp.lt.u32.totalorder %s155_s27, %s262_s1 }
  0x17   :  { %p161_p10 = pnand %p159_p9, %p156_p8 }
  0x19   :  { %164 = shalt.err (!%p161_p10)
}
  0x1a   :  { %s165_s4 = scalar_lea.vmem %s28_s24, 256  ;;  %p170_p12 = scmp.lt.s32.totalorder %s28_s24, %s28_s24 }
  0x1b   :  { %p166_p11 = scmp.ne.s32.totalorder %s28_s24, %s165_s4  ;;  %p171_p13 = scmp.lt.s32.totalorder %s165_s4, %s165_s4 }
  0x1d   :  { %p172_p0 = por %p171_p13, %p170_p12 }
  0x1f   :  { %p173_p1 = pnand %p172_p0, %p166_p11 }
  0x21   :  { %176 = shalt.err (!%p173_p1)
}
  0x22   :  { %33 = dma.hbm_to_vmem [thread:$0]  %s262_s1, 256, %s28_s24, [#allocation6], %s206_s19, %s206_s19, %s207_s20  }
  0x23   :  { %199 = dma.done.wait [#allocation3], 256  }
  0x24   :  { %200 = vsyncadd [#allocation3], 4294967040 }
  0x25   :  { %201 = dma.done.wait [#allocation6], 256  }
  0x26   :  { %202 = vsyncadd [#allocation6], 4294967040  ;;  %v40_v0 = vld [vmem:[#allocation2] sm:$0xff]  ;;  %v41_v1 = vld [vmem:[#allocation2 + $0x8] sm:$0xff]  ;;  %vm87_vm0 = vcmask 7168   ;;  %s209_s1 = smov [#allocation7]  }
  0x27   :  { %44 = vmax.xlane.f32.xlu0 %v40_v0  ;;  %v42_v12 = vld [vmem:[#allocation5] sm:$0xff]  ;;  %v43_v14 = vld [vmem:[#allocation5 + $0x8] sm:$0xff]  ;;  %s108_s6 = sshll.u32 %s209_s1, 4  ;;  %s109_s6 = int_to_ptr.vmem [resolvable:$true] %s108_s6 }
  0x28   :  { %v64_v13 = vmul.f32 0.9, %v42_v12  ;;  %v65_v18 = vmul.f32 0.9, %v43_v14  ;;  %s177_s8 = scalar_lea.vmem %s109_s6, 128  ;;  %p182_p3 = scmp.lt.s32.totalorder %s109_s6, %s109_s6 }
  0x29   :  { %p178_p2 = scmp.ne.s32.totalorder %s109_s6, %s177_s8  ;;  %p183_p4 = scmp.lt.s32.totalorder %s177_s8, %s177_s8 }
  0x2a   :  { %v66_v17 = vadd.f32 0.00078125, %v64_v13  ;;  %v67_v23 = vadd.f32 0.00078125, %v65_v18 }
  0x2b   :  { %46 = vmax.xlane.f32.xlu0 %v41_v1  ;;  %p184_p5 = por %p183_p4, %p182_p3 }
  0x2d   :  { %p185_p6 = pnand %p184_p5, %p178_p2 }
  0xb4   :  { %v45_v2 = vpop.xlane.xlu0 %44 }
  0xb5   :  { %v48_v3 = vsub.f32 %v40_v0, %v45_v2 }
  0xb7   :  { %v50_v4 = vmul.f32 1.442695, %v48_v3 }
  0xb8   :  { %v47_v5 = vpop.xlane.xlu0 %46 }
  0xb9   :  { %v49_v6 = vsub.f32 %v41_v1, %v47_v5  ;;  %125 = vpow2.f32 %v50_v4 }
  0xbb   :  { %v52_v7 = vmul.f32 1.442695, %v49_v6 }
  0xbd   :  { %127 = vpow2.f32 %v52_v7 }
  0xc3   :  { %v126_v8 = vpop.eup %125 }
  0xc4   :  { %54 = vadd.xlane.f32.xlu1 %v126_v8 }
  0xc7   :  { %v128_v9 = vpop.eup %127 }
  0xc8   :  { %56 = vadd.xlane.f32.xlu1 %v128_v9 }
 0x151   :  { %v55_v10 = vpop.xlane.xlu1 %54 }
 0x152   :  { %129 = vlog2.f32 %v55_v10 }
 0x155   :  { %v57_v11 = vpop.xlane.xlu1 %56 }
 0x156   :  { %131 = vlog2.f32 %v57_v11 }
 0x15c   :  { %v130_v15 = vpop.eup %129 }
 0x15d   :  { %v59_v16 = vmul.f32 0.6931472, %v130_v15 }
 0x15f   :  { %v62_v19 = vsub.f32 %v48_v3, %v59_v16 }
 0x160   :  { %v132_v20 = vpop.eup %131 }
 0x161   :  { %v61_v21 = vmul.f32 0.6931472, %v132_v20  ;;  %v68_v22 = vmul.f32 %v66_v17, %v62_v19 }
 0x163   :  { %70 = vadd.xlane.f32.xlu0 %v68_v22  ;;  %v63_v24 = vsub.f32 %v49_v6, %v61_v21 }
 0x165   :  { %v69_v25 = vmul.f32 %v67_v23, %v63_v24 }
 0x167   :  { %72 = vadd.xlane.f32.xlu1 %v69_v25 }
 0x1f0   :  { %v71_v26 = vpop.xlane.xlu0 %70 }
 0x1f1   :  { %v74_v27 = vsub.f32 0.0, %v71_v26 }
 0x1f3   :  { %v88_v31 = vsel %vm87_vm0, %v74_v27, 0.0 }
 0x1f4   :  { %v73_v28 = vpop.xlane.xlu1 %72 }
 0x1f5   :  { %v75_v29 = vsub.f32 0.0, %v73_v28 }
 0x1f7   :  { %v89_v30 = vsel %vm87_vm0, %v75_v29, 0.0 }
 0x1f8   :  { %v90_v32 = vadd.f32 %v89_v30, %v88_v31 }
 0x1fa   :  { %91 = vadd.xlane.f32.xlu0 %v90_v32 }
 0x287   :  { %v92_v33 = vpop.xlane.xlu0 %91 }
 0x288   :  { %v93_v34 = vrot.slane %v92_v33, 4 }
 0x28a   :  { %v94_v35 = vadd.f32 %v93_v34, %v92_v33 }
 0x28c   :  { %v95_v36 = vrot.slane %v94_v35, 2 }
 0x28e   :  { %v96_v37 = vadd.f32 %v95_v36, %v94_v35 }
 0x290   :  { %v97_v38 = vrot.slane %v96_v37, 1 }
 0x292   :  { %v98_v39 = vadd.f32 %v97_v38, %v96_v37 }
 0x294   :  { %118 = vpush %v98_v39 }
 0x2c5   :  { %s119_s7 = spop %118 }
 0x2c6   :  { %v100_v40 = vstv %s119_s7 }
 0x2c7   :  { %101 = vst [vmem:[#allocation7] sm:$0xff] %v100_v40 }
 0x2c8   :  { %188 = shalt.err (!%p185_p6)
}
 0x2c9   :  { %s189_s11 = scalar_lea.hbm %s263_s2, 128 }
 0x2ca   :  { %p190_p7 = scmp.ne.s32.totalorder %s263_s2, %s189_s11  ;;  %p193_p8 = scmp.lt.u32.totalorder %s189_s11, %s263_s2 }
 0x2cc   :  { %p195_p9 = pnand %p193_p8, %p190_p7 }
 0x2ce   :  { %198 = shalt.err (!%p195_p9)
}
 0x2cf   :  { %111 = dma.vmem_to_hbm [thread:$0]  %s109_s6, 128, %s263_s2, [#allocation4]  }
 0x2d0   :  { %203 = dma.done.wait [#allocation4], 128  }
 0x2d1   :  { %204 = vsyncadd [#allocation4], 4294967168 }
 0x2d2   :  { %115 = vsyncpa [#allocation3], 1 }
 0x2d3   :  { %116 = vsyncpa [#allocation6], 1 }
 0x2d4   :  { %117 = vsyncpa [#allocation4], 1 }

</bundles_post_ra>
